<compile_context>
chip_gen: v5e
topology: v5e:2x2
jax: 0.10.0
libtpu: 0.0.40
codegen_flags: <defaults>
</compile_context>

<pallas_src>
import functools

import jax
import jax.numpy as jnp
from jax.experimental import pallas as pl
from jax.experimental.pallas import tpu as pltpu

# Module hyper-parameters (STATE_DIM / ACTION_DIM are free constants in the
# reference code; pick small, TPU-friendly values).
STATE_DIM = 32
ACTION_DIM = 8
HIDDEN_SIZES = (128, 128)

PAD = 128          # lane-dense padded feature width for every layer in/out
N_LAYERS = 3
TB_MAX = 256       # max batch-tile rows per grid step


def _round_up(x, m):
    return (x + m - 1) // m * m


def noisy_policy_kernel(x_ref, w_ref, b_ref, out_ref, wc_ref, bc_ref):
    """One batch tile of the fused noisy-MLP forward.

    x_ref : (TB, 128) f32      state tile (features zero-padded to 128)
    w_ref : (3, 3, 128, 128)   [layer, {mu, sigma, eps}, in, out] f32
    b_ref : (3, 3, 1, 128)     [layer, {mu, sigma, eps}, 1, out]  f32
    out_ref: (TB, 128) f32     tanh(action) in cols [:ACTION_DIM], 0 elsewhere
    wc_ref: (3, 128, 128) bf16 VMEM scratch — combined noisy weights
    bc_ref: (3, 1, 128) f32    VMEM scratch — combined noisy biases
    """
    # Combine mu + sigma*eps ONCE per grid sweep (weights are resident across
    # batch tiles); combine in f32 (v5e has no bf16 VPU), cast to bf16 for MXU.
    @pl.when(pl.program_id(0) == 0)
    def _combine():
        for l in range(N_LAYERS):
            w = w_ref[l, 0] + w_ref[l, 1] * w_ref[l, 2]
            wc_ref[l] = w.astype(jnp.bfloat16)
            bc_ref[l] = b_ref[l, 0] + b_ref[l, 1] * b_ref[l, 2]

    x = x_ref[...].astype(jnp.bfloat16)

    # ---- fc1 (noisy linear) + relu ----
    h1 = jnp.dot(x, wc_ref[0], preferred_element_type=jnp.float32) + bc_ref[0]
    h1 = jnp.maximum(h1, 0.0)

    # ---- fc2 (noisy linear) + relu ----
    h2 = jnp.dot(h1.astype(jnp.bfloat16), wc_ref[1],
                 preferred_element_type=jnp.float32) + bc_ref[1]
    h2 = jnp.maximum(h2, 0.0)

    # ---- out (noisy linear) + tanh (padded cols are exactly 0 -> tanh(0)=0) ----
    a = jnp.dot(h2.astype(jnp.bfloat16), wc_ref[2],
                preferred_element_type=jnp.float32) + bc_ref[2]
    out_ref[...] = jnp.tanh(a)


@jax.jit
def noisy_policy_forward(x, w_stack, b_stack):
    """x: (B, STATE_DIM) f32; w_stack: (3,3,128,128); b_stack: (3,3,1,128)."""
    B, sd = x.shape
    TB = min(TB_MAX, _round_up(B, 8))
    B_pad = _round_up(B, TB)
    x_pad = jnp.pad(x, ((0, B_pad - B), (0, PAD - sd)))

    grid = (B_pad // TB,)
    out = pl.pallas_call(
        noisy_policy_kernel,
        out_shape=jax.ShapeDtypeStruct((B_pad, PAD), jnp.float32),
        grid_spec=pltpu.PrefetchScalarGridSpec(
            num_scalar_prefetch=0,
            grid=grid,
            in_specs=[
                pl.BlockSpec((TB, PAD), lambda i: (i, 0)),
                pl.BlockSpec((N_LAYERS, 3, PAD, PAD), lambda i: (0, 0, 0, 0)),
                pl.BlockSpec((N_LAYERS, 3, 1, PAD), lambda i: (0, 0, 0, 0)),
            ],
            out_specs=pl.BlockSpec((TB, PAD), lambda i: (i, 0)),
            scratch_shapes=[
                pltpu.VMEM((N_LAYERS, PAD, PAD), jnp.bfloat16),
                pltpu.VMEM((N_LAYERS, 1, PAD), jnp.float32),
            ],
        ),
        # "arbitrary": the combine-once-into-scratch init (pl.when pid==0) must
        # run before every other grid step on the same core, so we keep the
        # batch axis sequential.  (Measured parallel-vs-arbitrary delta is ~0.)
        compiler_params=pltpu.CompilerParams(
            dimension_semantics=("arbitrary",),
        ),
    )(x_pad, w_stack, b_stack)
    return out[:B, :ACTION_DIM]


# ----------------------------------------------------------------------------
# Parameter / noise construction matching the PyTorch module semantics.
# ----------------------------------------------------------------------------
def init_noisy_linear(key, in_dims, out_dims,
                      init_weight_sigma=0.017, init_bias_sigma=0.017):
    """Matches NoisyLinear.reset_params; weights stored as (in, out) so the
    kernel computes x @ W directly (torch uses (out, in) + F.linear)."""
    kw, kb = jax.random.split(key)
    bound = 1.0 / (in_dims ** 0.5)
    w_mu = jax.random.uniform(kw, (in_dims, out_dims), jnp.float32, -bound, bound)
    b_mu = jax.random.uniform(kb, (out_dims,), jnp.float32, -bound, bound)
    w_sig = jnp.full((in_dims, out_dims), init_weight_sigma, jnp.float32)
    b_sig = jnp.full((out_dims,), init_bias_sigma, jnp.float32)
    return (w_mu, w_sig, b_mu, b_sig)


def sample_noise(key, in_dims, out_dims, epsilon_sigma=1.0):
    kw, kb = jax.random.split(key)
    w_eps = epsilon_sigma * jax.random.normal(kw, (in_dims, out_dims), jnp.float32)
    b_eps = epsilon_sigma * jax.random.normal(kb, (out_dims,), jnp.float32)
    return (w_eps, b_eps)


def pack_params(params, noises):
    """Pack per-layer mu/sigma/eps into single zero-padded stacked tensors."""
    W = jnp.zeros((N_LAYERS, 3, PAD, PAD), jnp.float32)
    Bb = jnp.zeros((N_LAYERS, 3, 1, PAD), jnp.float32)
    for l, name in enumerate(("fc1", "fc2", "out")):
        w_mu, w_sig, b_mu, b_sig = params[name]
        w_eps, b_eps = noises[name]
        din, dout = w_mu.shape
        W = W.at[l, 0, :din, :dout].set(w_mu)
        W = W.at[l, 1, :din, :dout].set(w_sig)
        W = W.at[l, 2, :din, :dout].set(w_eps)
        Bb = Bb.at[l, 0, 0, :dout].set(b_mu)
        Bb = Bb.at[l, 1, 0, :dout].set(b_sig)
        Bb = Bb.at[l, 2, 0, :dout].set(b_eps)
    return W, Bb


if __name__ == "__main__":
    root = jax.random.PRNGKey(0)
    k_x, k1, k2, k3, n1, n2, n3 = jax.random.split(root, 7)

    B = 8
    x = jax.random.normal(k_x, (B, STATE_DIM), jnp.float32)

    dims = [
        ("fc1", STATE_DIM, HIDDEN_SIZES[0], k1, n1),
        ("fc2", HIDDEN_SIZES[0], HIDDEN_SIZES[1], k2, n2),
        ("out", HIDDEN_SIZES[1], ACTION_DIM, k3, n3),
    ]
    params, noises = {}, {}
    for name, d_in, d_out, kp, kn in dims:
        params[name] = init_noisy_linear(kp, d_in, d_out)
        noises[name] = sample_noise(kn, d_in, d_out)

    w_stack, b_stack = pack_params(params, noises)

    action = noisy_policy_forward(x, w_stack, b_stack)
    jax.block_until_ready(action)

    # Pure-JAX f32 reference of the same math (kernel uses bf16 MXU inputs with
    # f32 accumulation, so compare with a correspondingly loosened tolerance).
    def ref(x, params, noises):
        h = x
        for i, name in enumerate(("fc1", "fc2", "out")):
            w_mu, w_sig, b_mu, b_sig = params[name]
            w_eps, b_eps = noises[name]
            w = w_mu + w_sig * w_eps
            b = b_mu + b_sig * b_eps
            h = h @ w + b
            h = jnp.maximum(h, 0.0) if i < 2 else jnp.tanh(h)
        return h

    expected = ref(x, params, noises)
    assert action.shape == (B, ACTION_DIM)
    assert jnp.allclose(action, expected, atol=2e-2, rtol=2e-2), (
        float(jnp.max(jnp.abs(action - expected))))

    print("KERNEL_OK")
</pallas_src>

<mosaic_0001>
module attributes {stable_mosaic.version = 11 : i64} {
  func.func @noisy_policy_kernel(%arg0: i32, %arg1: memref<8x128xf32, #tpu.memory_space<vmem>>, %arg2: memref<3x3x128x128xf32, #tpu.memory_space<vmem>>, %arg3: memref<3x3x1x128xf32, #tpu.memory_space<vmem>>, %arg4: memref<8x128xf32, #tpu.memory_space<vmem>>, %arg5: memref<3x128x128xbf16, #tpu.memory_space<vmem>>, %arg6: memref<3x1x128xf32, #tpu.memory_space<vmem>>) attributes {dimension_semantics = [#tpu.dimension_semantics<arbitrary>], iteration_bounds = array<i64: 1>, scalar_prefetch = 0 : i64, scratch_operands = 2 : i64, tpu.core_type = #tpu.core_type<tc>, window_params = [{transform_indices = @transform_0, window_bounds = array<i64: 8, 128>}, {pipeline_mode = #tpu.pipeline_mode<synchronous>, transform_indices = @transform_1, window_bounds = array<i64: 3, 3, 128, 128>}, {pipeline_mode = #tpu.pipeline_mode<synchronous>, transform_indices = @transform_2, window_bounds = array<i64: 3, 3, 1, 128>}, {transform_indices = @transform_3, window_bounds = array<i64: 8, 128>}]} {
    %c0_i32 = arith.constant 0 : i32
    %0 = arith.cmpi eq, %arg0, %c0_i32 : i32
    %1 = arith.extui %0 : i1 to i32
    %c0_i32_0 = arith.constant 0 : i32
    %2 = arith.cmpi ne, %1, %c0_i32_0 : i32
    scf.if %2 {
      %c0_24 = arith.constant 0 : index
      %c0_25 = arith.constant 0 : index
      %c0_26 = arith.constant 0 : index
      %c0_27 = arith.constant 0 : index
      %34 = vector.load %arg2[%c0_24, %c0_25, %c0_26, %c0_27] : memref<3x3x128x128xf32, #tpu.memory_space<vmem>>, vector<1x1x128x128xf32>
      %35 = vector.shape_cast %34 : vector<1x1x128x128xf32> to vector<128x128xf32>
      %c0_28 = arith.constant 0 : index
      %c1_29 = arith.constant 1 : index
      %c0_30 = arith.constant 0 : index
      %c0_31 = arith.constant 0 : index
      %36 = vector.load %arg2[%c0_28, %c1_29, %c0_30, %c0_31] : memref<3x3x128x128xf32, #tpu.memory_space<vmem>>, vector<1x1x128x128xf32>
      %37 = vector.shape_cast %36 : vector<1x1x128x128xf32> to vector<128x128xf32>
      %c0_32 = arith.constant 0 : index
      %c2_33 = arith.constant 2 : index
      %c0_34 = arith.constant 0 : index
      %c0_35 = arith.constant 0 : index
      %38 = vector.load %arg2[%c0_32, %c2_33, %c0_34, %c0_35] : memref<3x3x128x128xf32, #tpu.memory_space<vmem>>, vector<1x1x128x128xf32>
      %39 = vector.shape_cast %38 : vector<1x1x128x128xf32> to vector<128x128xf32>
      %40 = arith.mulf %37, %39 : vector<128x128xf32>
      %41 = arith.addf %35, %40 : vector<128x128xf32>
      %42 = arith.truncf %41 : vector<128x128xf32> to vector<128x128xbf16>
      %c0_36 = arith.constant 0 : index
      %c0_37 = arith.constant 0 : index
      %c0_38 = arith.constant 0 : index
      %43 = vector.load %arg5[%c0_36, %c0_37, %c0_38] : memref<3x128x128xbf16, #tpu.memory_space<vmem>>, vector<1x128x128xbf16>
      %44 = vector.shape_cast %43 : vector<1x128x128xbf16> to vector<128x128xbf16>
      %45 = vector.shape_cast %42 : vector<128x128xbf16> to vector<1x128x128xbf16>
      tpu.vector_store %arg5[%c0_36, %c0_37, %c0_38], %45 {strides = array<i32>} : memref<3x128x128xbf16, #tpu.memory_space<vmem>>, vector<1x128x128xbf16>,
      %c0_39 = arith.constant 0 : index
      %c0_40 = arith.constant 0 : index
      %c0_41 = arith.constant 0 : index
      %c0_42 = arith.constant 0 : index
      %46 = vector.load %arg3[%c0_39, %c0_40, %c0_41, %c0_42] : memref<3x3x1x128xf32, #tpu.memory_space<vmem>>, vector<1x1x1x128xf32>
      %47 = vector.shape_cast %46 : vector<1x1x1x128xf32> to vector<1x128xf32>
      %c0_43 = arith.constant 0 : index
      %c1_44 = arith.constant 1 : index
      %c0_45 = arith.constant 0 : index
      %c0_46 = arith.constant 0 : index
      %48 = vector.load %arg3[%c0_43, %c1_44, %c0_45, %c0_46] : memref<3x3x1x128xf32, #tpu.memory_space<vmem>>, vector<1x1x1x128xf32>
      %49 = vector.shape_cast %48 : vector<1x1x1x128xf32> to vector<1x128xf32>
      %c0_47 = arith.constant 0 : index
      %c2_48 = arith.constant 2 : index
      %c0_49 = arith.constant 0 : index
      %c0_50 = arith.constant 0 : index
      %50 = vector.load %arg3[%c0_47, %c2_48, %c0_49, %c0_50] : memref<3x3x1x128xf32, #tpu.memory_space<vmem>>, vector<1x1x1x128xf32>
      %51 = vector.shape_cast %50 : vector<1x1x1x128xf32> to vector<1x128xf32>
      %52 = arith.mulf %49, %51 : vector<1x128xf32>
      %53 = arith.addf %47, %52 : vector<1x128xf32>
      %c0_51 = arith.constant 0 : index
      %c0_52 = arith.constant 0 : index
      %c0_53 = arith.constant 0 : index
      %54 = vector.load %arg6[%c0_51, %c0_52, %c0_53] : memref<3x1x128xf32, #tpu.memory_space<vmem>>, vector<1x1x128xf32>
      %55 = vector.shape_cast %54 : vector<1x1x128xf32> to vector<1x128xf32>
      %56 = vector.shape_cast %53 : vector<1x128xf32> to vector<1x1x128xf32>
      tpu.vector_store %arg6[%c0_51, %c0_52, %c0_53], %56 {strides = array<i32>} : memref<3x1x128xf32, #tpu.memory_space<vmem>>, vector<1x1x128xf32>,
      %c1_54 = arith.constant 1 : index
      %c0_55 = arith.constant 0 : index
      %c0_56 = arith.constant 0 : index
      %c0_57 = arith.constant 0 : index
      %57 = vector.load %arg2[%c1_54, %c0_55, %c0_56, %c0_57] : memref<3x3x128x128xf32, #tpu.memory_space<vmem>>, vector<1x1x128x128xf32>
      %58 = vector.shape_cast %57 : vector<1x1x128x128xf32> to vector<128x128xf32>
      %c1_58 = arith.constant 1 : index
      %c1_59 = arith.constant 1 : index
      %c0_60 = arith.constant 0 : index
      %c0_61 = arith.constant 0 : index
      %59 = vector.load %arg2[%c1_58, %c1_59, %c0_60, %c0_61] : memref<3x3x128x128xf32, #tpu.memory_space<vmem>>, vector<1x1x128x128xf32>
      %60 = vector.shape_cast %59 : vector<1x1x128x128xf32> to vector<128x128xf32>
      %c1_62 = arith.constant 1 : index
      %c2_63 = arith.constant 2 : index
      %c0_64 = arith.constant 0 : index
      %c0_65 = arith.constant 0 : index
      %61 = vector.load %arg2[%c1_62, %c2_63, %c0_64, %c0_65] : memref<3x3x128x128xf32, #tpu.memory_space<vmem>>, vector<1x1x128x128xf32>
      %62 = vector.shape_cast %61 : vector<1x1x128x128xf32> to vector<128x128xf32>
      %63 = arith.mulf %60, %62 : vector<128x128xf32>
      %64 = arith.addf %58, %63 : vector<128x128xf32>
      %65 = arith.truncf %64 : vector<128x128xf32> to vector<128x128xbf16>
      %c1_66 = arith.constant 1 : index
      %c0_67 = arith.constant 0 : index
      %c0_68 = arith.constant 0 : index
      %66 = vector.load %arg5[%c1_66, %c0_67, %c0_68] : memref<3x128x128xbf16, #tpu.memory_space<vmem>>, vector<1x128x128xbf16>
      %67 = vector.shape_cast %66 : vector<1x128x128xbf16> to vector<128x128xbf16>
      %68 = vector.shape_cast %65 : vector<128x128xbf16> to vector<1x128x128xbf16>
      tpu.vector_store %arg5[%c1_66, %c0_67, %c0_68], %68 {strides = array<i32>} : memref<3x128x128xbf16, #tpu.memory_space<vmem>>, vector<1x128x128xbf16>,
      %c1_69 = arith.constant 1 : index
      %c0_70 = arith.constant 0 : index
      %c0_71 = arith.constant 0 : index
      %c0_72 = arith.constant 0 : index
      %69 = vector.load %arg3[%c1_69, %c0_70, %c0_71, %c0_72] : memref<3x3x1x128xf32, #tpu.memory_space<vmem>>, vector<1x1x1x128xf32>
      %70 = vector.shape_cast %69 : vector<1x1x1x128xf32> to vector<1x128xf32>
      %c1_73 = arith.constant 1 : index
      %c1_74 = arith.constant 1 : index
      %c0_75 = arith.constant 0 : index
      %c0_76 = arith.constant 0 : index
      %71 = vector.load %arg3[%c1_73, %c1_74, %c0_75, %c0_76] : memref<3x3x1x128xf32, #tpu.memory_space<vmem>>, vector<1x1x1x128xf32>
      %72 = vector.shape_cast %71 : vector<1x1x1x128xf32> to vector<1x128xf32>
      %c1_77 = arith.constant 1 : index
      %c2_78 = arith.constant 2 : index
      %c0_79 = arith.constant 0 : index
      %c0_80 = arith.constant 0 : index
      %73 = vector.load %arg3[%c1_77, %c2_78, %c0_79, %c0_80] : memref<3x3x1x128xf32, #tpu.memory_space<vmem>>, vector<1x1x1x128xf32>
      %74 = vector.shape_cast %73 : vector<1x1x1x128xf32> to vector<1x128xf32>
      %75 = arith.mulf %72, %74 : vector<1x128xf32>
      %76 = arith.addf %70, %75 : vector<1x128xf32>
      %c1_81 = arith.constant 1 : index
      %c0_82 = arith.constant 0 : index
      %c0_83 = arith.constant 0 : index
      %77 = vector.load %arg6[%c1_81, %c0_82, %c0_83] : memref<3x1x128xf32, #tpu.memory_space<vmem>>, vector<1x1x128xf32>
      %78 = vector.shape_cast %77 : vector<1x1x128xf32> to vector<1x128xf32>
      %79 = vector.shape_cast %76 : vector<1x128xf32> to vector<1x1x128xf32>
      tpu.vector_store %arg6[%c1_81, %c0_82, %c0_83], %79 {strides = array<i32>} : memref<3x1x128xf32, #tpu.memory_space<vmem>>, vector<1x1x128xf32>,
      %c2_84 = arith.constant 2 : index
      %c0_85 = arith.constant 0 : index
      %c0_86 = arith.constant 0 : index
      %c0_87 = arith.constant 0 : index
      %80 = vector.load %arg2[%c2_84, %c0_85, %c0_86, %c0_87] : memref<3x3x128x128xf32, #tpu.memory_space<vmem>>, vector<1x1x128x128xf32>
      %81 = vector.shape_cast %80 : vector<1x1x128x128xf32> to vector<128x128xf32>
      %c2_88 = arith.constant 2 : index
      %c1_89 = arith.constant 1 : index
      %c0_90 = arith.constant 0 : index
      %c0_91 = arith.constant 0 : index
      %82 = vector.load %arg2[%c2_88, %c1_89, %c0_90, %c0_91] : memref<3x3x128x128xf32, #tpu.memory_space<vmem>>, vector<1x1x128x128xf32>
      %83 = vector.shape_cast %82 : vector<1x1x128x128xf32> to vector<128x128xf32>
      %c2_92 = arith.constant 2 : index
      %c2_93 = arith.constant 2 : index
      %c0_94 = arith.constant 0 : index
      %c0_95 = arith.constant 0 : index
      %84 = vector.load %arg2[%c2_92, %c2_93, %c0_94, %c0_95] : memref<3x3x128x128xf32, #tpu.memory_space<vmem>>, vector<1x1x128x128xf32>
      %85 = vector.shape_cast %84 : vector<1x1x128x128xf32> to vector<128x128xf32>
      %86 = arith.mulf %83, %85 : vector<128x128xf32>
      %87 = arith.addf %81, %86 : vector<128x128xf32>
      %88 = arith.truncf %87 : vector<128x128xf32> to vector<128x128xbf16>
      %c2_96 = arith.constant 2 : index
      %c0_97 = arith.constant 0 : index
      %c0_98 = arith.constant 0 : index
      %89 = vector.load %arg5[%c2_96, %c0_97, %c0_98] : memref<3x128x128xbf16, #tpu.memory_space<vmem>>, vector<1x128x128xbf16>
      %90 = vector.shape_cast %89 : vector<1x128x128xbf16> to vector<128x128xbf16>
      %91 = vector.shape_cast %88 : vector<128x128xbf16> to vector<1x128x128xbf16>
      tpu.vector_store %arg5[%c2_96, %c0_97, %c0_98], %91 {strides = array<i32>} : memref<3x128x128xbf16, #tpu.memory_space<vmem>>, vector<1x128x128xbf16>,
      %c2_99 = arith.constant 2 : index
      %c0_100 = arith.constant 0 : index
      %c0_101 = arith.constant 0 : index
      %c0_102 = arith.constant 0 : index
      %92 = vector.load %arg3[%c2_99, %c0_100, %c0_101, %c0_102] : memref<3x3x1x128xf32, #tpu.memory_space<vmem>>, vector<1x1x1x128xf32>
      %93 = vector.shape_cast %92 : vector<1x1x1x128xf32> to vector<1x128xf32>
      %c2_103 = arith.constant 2 : index
      %c1_104 = arith.constant 1 : index
      %c0_105 = arith.constant 0 : index
      %c0_106 = arith.constant 0 : index
      %94 = vector.load %arg3[%c2_103, %c1_104, %c0_105, %c0_106] : memref<3x3x1x128xf32, #tpu.memory_space<vmem>>, vector<1x1x1x128xf32>
      %95 = vector.shape_cast %94 : vector<1x1x1x128xf32> to vector<1x128xf32>
      %c2_107 = arith.constant 2 : index
      %c2_108 = arith.constant 2 : index
      %c0_109 = arith.constant 0 : index
      %c0_110 = arith.constant 0 : index
      %96 = vector.load %arg3[%c2_107, %c2_108, %c0_109, %c0_110] : memref<3x3x1x128xf32, #tpu.memory_space<vmem>>, vector<1x1x1x128xf32>
      %97 = vector.shape_cast %96 : vector<1x1x1x128xf32> to vector<1x128xf32>
      %98 = arith.mulf %95, %97 : vector<1x128xf32>
      %99 = arith.addf %93, %98 : vector<1x128xf32>
      %c2_111 = arith.constant 2 : index
      %c0_112 = arith.constant 0 : index
      %c0_113 = arith.constant 0 : index
      %100 = vector.load %arg6[%c2_111, %c0_112, %c0_113] : memref<3x1x128xf32, #tpu.memory_space<vmem>>, vector<1x1x128xf32>
      %101 = vector.shape_cast %100 : vector<1x1x128xf32> to vector<1x128xf32>
      %102 = vector.shape_cast %99 : vector<1x128xf32> to vector<1x1x128xf32>
      tpu.vector_store %arg6[%c2_111, %c0_112, %c0_113], %102 {strides = array<i32>} : memref<3x1x128xf32, #tpu.memory_space<vmem>>, vector<1x1x128xf32>,
    } else {
    }
    %c0 = arith.constant 0 : index
    %c0_1 = arith.constant 0 : index
    %3 = vector.load %arg1[%c0, %c0_1] : memref<8x128xf32, #tpu.memory_space<vmem>>, vector<8x128xf32>
    %4 = arith.truncf %3 : vector<8x128xf32> to vector<8x128xbf16>
    %c0_2 = arith.constant 0 : index
    %c0_3 = arith.constant 0 : index
    %c0_4 = arith.constant 0 : index
    %5 = vector.load %arg5[%c0_2, %c0_3, %c0_4] : memref<3x128x128xbf16, #tpu.memory_space<vmem>>, vector<1x128x128xbf16>
    %6 = vector.shape_cast %5 : vector<1x128x128xbf16> to vector<128x128xbf16>
    %cst = arith.constant dense<0.000000e+00> : vector<8x128xf32>
    %7 = tpu.matmul %4, %6, %cst {dimension_numbers = #tpu.dot_dimension_numbers<[1], [0], [0], [1], [0, 0, 1, 1], [], []>} : vector<8x128xbf16>, vector<128x128xbf16>, vector<8x128xf32> -> vector<8x128xf32>
    %c0_5 = arith.constant 0 : index
    %c0_6 = arith.constant 0 : index
    %c0_7 = arith.constant 0 : index
    %8 = vector.load %arg6[%c0_5, %c0_6, %c0_7] : memref<3x1x128xf32, #tpu.memory_space<vmem>>, vector<1x1x128xf32>
    %9 = vector.shape_cast %8 : vector<1x1x128xf32> to vector<1x128xf32>
    %10 = vector.broadcast %9 : vector<1x128xf32> to vector<8x128xf32>
    %11 = arith.addf %7, %10 : vector<8x128xf32>
    %cst_8 = arith.constant 0.000000e+00 : f32
    %12 = vector.broadcast %cst_8 : f32 to vector<8x128xf32>
    %13 = arith.maximumf %11, %12 : vector<8x128xf32>
    %14 = arith.truncf %13 : vector<8x128xf32> to vector<8x128xbf16>
    %c1 = arith.constant 1 : index
    %c0_9 = arith.constant 0 : index
    %c0_10 = arith.constant 0 : index
    %15 = vector.load %arg5[%c1, %c0_9, %c0_10] : memref<3x128x128xbf16, #tpu.memory_space<vmem>>, vector<1x128x128xbf16>
    %16 = vector.shape_cast %15 : vector<1x128x128xbf16> to vector<128x128xbf16>
    %cst_11 = arith.constant dense<0.000000e+00> : vector<8x128xf32>
    %17 = tpu.matmul %14, %16, %cst_11 {dimension_numbers = #tpu.dot_dimension_numbers<[1], [0], [0], [1], [0, 0, 1, 1], [], []>} : vector<8x128xbf16>, vector<128x128xbf16>, vector<8x128xf32> -> vector<8x128xf32>
    %c1_12 = arith.constant 1 : index
    %c0_13 = arith.constant 0 : index
    %c0_14 = arith.constant 0 : index
    %18 = vector.load %arg6[%c1_12, %c0_13, %c0_14] : memref<3x1x128xf32, #tpu.memory_space<vmem>>, vector<1x1x128xf32>
    %19 = vector.shape_cast %18 : vector<1x1x128xf32> to vector<1x128xf32>
    %20 = vector.broadcast %19 : vector<1x128xf32> to vector<8x128xf32>
    %21 = arith.addf %17, %20 : vector<8x128xf32>
    %cst_15 = arith.constant 0.000000e+00 : f32
    %22 = vector.broadcast %cst_15 : f32 to vector<8x128xf32>
    %23 = arith.maximumf %21, %22 : vector<8x128xf32>
    %24 = arith.truncf %23 : vector<8x128xf32> to vector<8x128xbf16>
    %c2 = arith.constant 2 : index
    %c0_16 = arith.constant 0 : index
    %c0_17 = arith.constant 0 : index
    %25 = vector.load %arg5[%c2, %c0_16, %c0_17] : memref<3x128x128xbf16, #tpu.memory_space<vmem>>, vector<1x128x128xbf16>
    %26 = vector.shape_cast %25 : vector<1x128x128xbf16> to vector<128x128xbf16>
    %cst_18 = arith.constant dense<0.000000e+00> : vector<8x128xf32>
    %27 = tpu.matmul %24, %26, %cst_18 {dimension_numbers = #tpu.dot_dimension_numbers<[1], [0], [0], [1], [0, 0, 1, 1], [], []>} : vector<8x128xbf16>, vector<128x128xbf16>, vector<8x128xf32> -> vector<8x128xf32>
    %c2_19 = arith.constant 2 : index
    %c0_20 = arith.constant 0 : index
    %c0_21 = arith.constant 0 : index
    %28 = vector.load %arg6[%c2_19, %c0_20, %c0_21] : memref<3x1x128xf32, #tpu.memory_space<vmem>>, vector<1x1x128xf32>
    %29 = vector.shape_cast %28 : vector<1x1x128xf32> to vector<1x128xf32>
    %30 = vector.broadcast %29 : vector<1x128xf32> to vector<8x128xf32>
    %31 = arith.addf %27, %30 : vector<8x128xf32>
    %32 = math.tanh %31 : vector<8x128xf32>
    %c0_22 = arith.constant 0 : index
    %c0_23 = arith.constant 0 : index
    %33 = vector.load %arg4[%c0_22, %c0_23] : memref<8x128xf32, #tpu.memory_space<vmem>>, vector<8x128xf32>
    tpu.vector_store %arg4[%c0_22, %c0_23], %32 {strides = array<i32>} : memref<8x128xf32, #tpu.memory_space<vmem>>, vector<8x128xf32>,
    return
  }
  func.func @transform_0(%arg0: i32) -> (i32, i32) {
    %c0_i32 = arith.constant 0 : i32
    %c0_i32_0 = arith.constant 0 : i32
    return %arg0, %c0_i32 : i32, i32
  }
  func.func @transform_1(%arg0: i32) -> (i32, i32, i32, i32) {
    %c0_i32 = arith.constant 0 : i32
    %c0_i32_0 = arith.constant 0 : i32
    %c0_i32_1 = arith.constant 0 : i32
    %c0_i32_2 = arith.constant 0 : i32
    %c0_i32_3 = arith.constant 0 : i32
    return %c0_i32, %c0_i32_0, %c0_i32_1, %c0_i32_2 : i32, i32, i32, i32
  }
  func.func @transform_2(%arg0: i32) -> (i32, i32, i32, i32) {
    %c0_i32 = arith.constant 0 : i32
    %c0_i32_0 = arith.constant 0 : i32
    %c0_i32_1 = arith.constant 0 : i32
    %c0_i32_2 = arith.constant 0 : i32
    %c0_i32_3 = arith.constant 0 : i32
    return %c0_i32, %c0_i32_0, %c0_i32_1, %c0_i32_2 : i32, i32, i32, i32
  }
  func.func @transform_3(%arg0: i32) -> (i32, i32) {
    %c0_i32 = arith.constant 0 : i32
    %c0_i32_0 = arith.constant 0 : i32
    return %arg0, %c0_i32 : i32, i32
  }
}

</mosaic_0001>

<bundles_post_ra>
// kernel: noisy_policy_forward.1
= control target key start
LH: loop header
LB: loop body
LE: loop exit
PB: predicated region body
PF: predicated region fallthrough
CT: control target
= control target key end

     0   :  { %8 = vsyncpa [#allocation5], 0  ;;  %s1071_s0 = inlined_call_operand.vmem [shape: f32[8,128], index: 0, kind: input, shape index: {}]   ;;  %s1072_s1 = inlined_call_operand.hbm [shape: f32[3,3,128,128], index: 1, kind: input, shape index: {}]   ;;  %s1073_s2 = inlined_call_operand.vmem [shape: f32[3,3,1,128], index: 2, kind: input, shape index: {}]   ;;  %s1074_s3 = inlined_call_operand.hbm [shape: f32[8,128], index: 3, kind: output, shape index: {}]  }
   0x1   :  { %9 = vsyncpa [#allocation6], 0  ;;  %s16_s14 = sshll.u32 %s1072_s1, 4  ;;  %s1011_s15 = smov [#allocation4]   ;;  %s17_s14 = int_to_ptr.hbm [resolvable:$true] %s16_s14 }
   0x2   :  { %s18_s16 = sshll.u32 %s1011_s15, 4  ;;  %s1012_s17 = smov 128   ;;  %s19_s16 = int_to_ptr.vmem [resolvable:$true] %s18_s16 }
   0x3   :  { %s1013_s18 = smov 8  }
   0x4   :  { %24 = dma.hbm_to_vmem [thread:$0]  %s17_s14, 18432, %s19_s16, [#allocation5], %s1012_s17, %s1012_s17, %s1013_s18  }
   0x5   :  { %1007 = dma.done.wait [#allocation5], 18432  }
   0x6   :  { %1008 = vsyncadd [#allocation5], 4294948864  ;;  %v49_v0 = vld [vmem:[#allocation4 + $0x70] sm:$0xff]  ;;  %v50_v1 = vld [vmem:[#allocation4 + $0x78] sm:$0xff]  ;;  %s1014_s10 = smov [#allocation7]  }
   0x7   :  { %v66_v2 = vld [vmem:[#allocation4 + $0xf0] sm:$0xff]  ;;  %v67_v3 = vld [vmem:[#allocation4 + $0xf8] sm:$0xff]  ;;  %v47_v8 = vld [vmem:[#allocation4 + $0x60] sm:$0xff]  ;;  %s669_s11 = sshll.u32 %s1014_s10, 4  ;;  %s670_s11 = int_to_ptr.vmem [resolvable:$true] %s669_s11 }
   0x8   :  { %v83_v4 = vld [vmem:[#allocation4 + $0x170] sm:$0xff]  ;;  %v84_v5 = vld [vmem:[#allocation4 + $0x178] sm:$0xff]  ;;  %v48_v9 = vld [vmem:[#allocation4 + $0x68] sm:$0xff] }
   0x9   :  { %v99_v6 = vmul.f32 %v83_v4, %v66_v2  ;;  %v100_v7 = vmul.f32 %v84_v5, %v67_v3  ;;  %v64_v10 = vld [vmem:[#allocation4 + $0xe0] sm:$0xff]  ;;  %v65_v11 = vld [vmem:[#allocation4 + $0xe8] sm:$0xff]  ;;  %v45_v18 = vld [vmem:[#allocation4 + $0x50] sm:$0xff] }
   0xa   :  { %v81_v12 = vld [vmem:[#allocation4 + $0x160] sm:$0xff]  ;;  %v82_v13 = vld [vmem:[#allocation4 + $0x168] sm:$0xff]  ;;  %v46_v19 = vld [vmem:[#allocation4 + $0x58] sm:$0xff] }
   0xb   :  { %v115_v14 = vadd.f32 %v99_v6, %v49_v0  ;;  %v116_v15 = vadd.f32 %v100_v7, %v50_v1  ;;  %v97_v16 = vmul.f32 %v81_v12, %v64_v10  ;;  %v98_v17 = vmul.f32 %v82_v13, %v65_v11  ;;  %v62_v20 = vld [vmem:[#allocation4 + $0xd0] sm:$0xff]  ;;  %v63_v21 = vld [vmem:[#allocation4 + $0xd8] sm:$0xff]  ;;  %v43_v28 = vld [vmem:[#allocation4 + $0x40] sm:$0xff] }
   0xc   :  { %v79_v22 = vld [vmem:[#allocation4 + $0x150] sm:$0xff]  ;;  %v80_v23 = vld [vmem:[#allocation4 + $0x158] sm:$0xff]  ;;  %v44_v29 = vld [vmem:[#allocation4 + $0x48] sm:$0xff] }
   0xd   :  { %v847_v24 = vpack.c.bf16 %v116_v15, %v115_v14  ;;  %v113_v25 = vadd.f32 %v97_v16, %v47_v8  ;;  %v114_v26 = vadd.f32 %v98_v17, %v48_v9  ;;  %v95_v27 = vmul.f32 %v79_v22, %v62_v20  ;;  %v60_v30 = vld [vmem:[#allocation4 + $0xc0] sm:$0xff]  ;;  %v61_v32 = vld [vmem:[#allocation4 + $0xc8] sm:$0xff]  ;;  %v41_v39 = vld [vmem:[#allocation4 + $0x30] sm:$0xff] }
   0xe   :  { %v96_v31 = vmul.f32 %v80_v23, %v63_v21  ;;  %v77_v33 = vld [vmem:[#allocation4 + $0x140] sm:$0xff]  ;;  %v78_v34 = vld [vmem:[#allocation4 + $0x148] sm:$0xff]  ;;  %v42_v40 = vld [vmem:[#allocation4 + $0x38] sm:$0xff] }
   0xf   :  { %935 = vst [vmem:[#allocation2 + $0x78] sm:$0xff] %v847_v24   ;;  %v842_v35 = vpack.c.bf16 %v114_v26, %v113_v25  ;;  %v111_v36 = vadd.f32 %v95_v27, %v45_v18  ;;  %v93_v37 = vmul.f32 %v77_v33, %v60_v30  ;;  %v94_v38 = vmul.f32 %v78_v34, %v61_v32  ;;  %v58_v41 = vld [vmem:[#allocation4 + $0xb0] sm:$0xff]  ;;  %v59_v43 = vld [vmem:[#allocation4 + $0xb8] sm:$0xff]  ;;  %v39_v50 = vld [vmem:[#allocation4 + $0x20] sm:$0xff] }
  0x10   :  { %v112_v42 = vadd.f32 %v96_v31, %v46_v19  ;;  %v75_v44 = vld [vmem:[#allocation4 + $0x130] sm:$0xff]  ;;  %v76_v45 = vld [vmem:[#allocation4 + $0x138] sm:$0xff]  ;;  %v40_v51 = vld [vmem:[#allocation4 + $0x28] sm:$0xff] }
  0x11   :  { %934 = vst [vmem:[#allocation2 + $0x40] sm:$0xff] %v842_v35   ;;  %v109_v46 = vadd.f32 %v93_v37, %v43_v28  ;;  %v110_v47 = vadd.f32 %v94_v38, %v44_v29  ;;  %v91_v48 = vmul.f32 %v75_v44, %v58_v41  ;;  %v92_v49 = vmul.f32 %v76_v45, %v59_v43  ;;  %v56_v52 = vld [vmem:[#allocation4 + $0xa0] sm:$0xff]  ;;  %v57_v54 = vld [vmem:[#allocation4 + $0xa8] sm:$0xff]  ;;  %v37_v61 = vld [vmem:[#allocation4 + $0x10] sm:$0xff] }
  0x12   :  { %v837_v53 = vpack.c.bf16 %v112_v42, %v111_v36  ;;  %v73_v55 = vld [vmem:[#allocation4 + $0x120] sm:$0xff]  ;;  %v74_v56 = vld [vmem:[#allocation4 + $0x128] sm:$0xff]  ;;  %v38_v62 = vld [vmem:[#allocation4 + $0x18] sm:$0xff] }
  0x13   :  { %v832_v57 = vpack.c.bf16 %v110_v47, %v109_v46  ;;  %v107_v58 = vadd.f32 %v91_v48, %v41_v39  ;;  %v108_v59 = vadd.f32 %v92_v49, %v42_v40  ;;  %v89_v60 = vmul.f32 %v73_v55, %v56_v52  ;;  %v54_v63 = vld [vmem:[#allocation4 + $0x90] sm:$0xff]  ;;  %v55_v1 = vld [vmem:[#allocation4 + $0x98] sm:$0xff]  ;;  %v35_v8 = vld [vmem:[#allocation4] sm:$0xff] }
  0x14   :  { %933 = vst [vmem:[#allocation2 + $0x28] sm:$0xff] %v837_v53   ;;  %v90_v0 = vmul.f32 %v74_v56, %v57_v54  ;;  %v71_v2 = vld [vmem:[#allocation4 + $0x110] sm:$0xff]  ;;  %v72_v3 = vld [vmem:[#allocation4 + $0x118] sm:$0xff]  ;;  %v52_v9 = vld [vmem:[#allocation4 + $0x80] sm:$0xff] }
  0x15   :  { %932 = vst [vmem:[#allocation2 + $0x60] sm:$0xff] %v832_v57   ;;  %v827_v4 = vpack.c.bf16 %v108_v59, %v107_v58  ;;  %v105_v5 = vadd.f32 %v89_v60, %v39_v50  ;;  %v87_v6 = vmul.f32 %v71_v2, %v54_v63  ;;  %v88_v7 = vmul.f32 %v72_v3, %v55_v1  ;;  %v53_v12 = vld [vmem:[#allocation4 + $0x88] sm:$0xff]  ;;  %v69_v13 = vld [vmem:[#allocation4 + $0x100] sm:$0xff]  ;;  %v172_v19 = vld [vmem:[#allocation4 + $0x1f0] sm:$0xff] }
  0x16   :  { %v792_v10 = vld [vmem:[#allocation2 + $0x78] sm:$0xff]  ;;  %v106_v11 = vadd.f32 %v90_v0, %v40_v51  ;;  %v36_v16 = vld [vmem:[#allocation4 + $0x8] sm:$0xff]  ;;  %v85_v18 = vmul.f32 %v69_v13, %v52_v9  ;;  %v187_v33 = vld [vmem:[#allocation4 + $0x260] sm:$0xff] }
  0x17   :  { %931 = vst [vmem:[#allocation2 + $0x48] sm:$0xff] %v827_v4   ;;  %v103_v14 = vadd.f32 %v87_v6, %v37_v61  ;;  %v104_v15 = vadd.f32 %v88_v7, %v38_v62  ;;  %v70_v17 = vld [vmem:[#allocation4 + $0x108] sm:$0xff]  ;;  %479 = vmatpush.bf16.msra.mxu0 %v792_v10  ;;  %v173_v23 = vld [vmem:[#allocation4 + $0x1f8] sm:$0xff]  ;;  %v189_v24 = vld [vmem:[#allocation4 + $0x270] sm:$0xff] }
  0x18   :  { %v791_v20 = vld [vmem:[#allocation2 + $0x40] sm:$0xff]  ;;  %v822_v21 = vpack.c.bf16 %v106_v11, %v105_v5  ;;  %v86_v22 = vmul.f32 %v70_v17, %v53_v12  ;;  %v101_v26 = vadd.f32 %v85_v18, %v35_v8  ;;  %v206_v28 = vld [vmem:[#allocation4 + $0x2f0] sm:$0xff]  ;;  %v188_v35 = vld [vmem:[#allocation4 + $0x268] sm:$0xff] }
  0x19   :  { %v817_v25 = vpack.c.bf16 %v104_v15, %v103_v14  ;;  %v190_v27 = vld [vmem:[#allocation4 + $0x278] sm:$0xff]  ;;  %v222_v31 = vmul.f32 %v206_v28, %v189_v24  ;;  %v170_v34 = vld [vmem:[#allocation4 + $0x1e0] sm:$0xff]  ;;  %v171_v41 = vld [vmem:[#allocation4 + $0x1e8] sm:$0xff] }
  0x1a   :  { %v207_v29 = vld [vmem:[#allocation4 + $0x2f8] sm:$0xff]  ;;  %930 = vst [vmem:[#allocation2 + $0x10] sm:$0xff] %v822_v21   ;;  %v102_v30 = vadd.f32 %v86_v22, %v36_v16  ;;  %v204_v36 = vld [vmem:[#allocation4 + $0x2e0] sm:$0xff]  ;;  %v205_v42 = vld [vmem:[#allocation4 + $0x2e8] sm:$0xff] }
  0x1b   :  { %v223_v32 = vmul.f32 %v207_v29, %v190_v27  ;;  %929 = vst [vmem:[#allocation2] sm:$0xff] %v817_v25   ;;  %480 = vmatpush.bf16.msra.mxu0 %v791_v20  ;;  %v790_v37 = vld [vmem:[#allocation2 + $0x28] sm:$0xff]  ;;  %v238_v39 = vadd.f32 %v222_v31, %v172_v19  ;;  %v220_v43 = vmul.f32 %v204_v36, %v187_v33  ;;  %v168_v45 = vld [vmem:[#allocation4 + $0x1d0] sm:$0xff]  ;;  %v186_v47 = vld [vmem:[#allocation4 + $0x258] sm:$0xff] }
  0x1c   :  { %v812_v38 = vpack.c.bf16 %v102_v30, %v101_v26  ;;  %v221_v44 = vmul.f32 %v205_v42, %v188_v35  ;;  %v185_v46 = vld [vmem:[#allocation4 + $0x250] sm:$0xff]  ;;  %v169_v50 = vld [vmem:[#allocation4 + $0x1d8] sm:$0xff]  ;;  %v166_v57 = vld [vmem:[#allocation4 + $0x1c0] sm:$0xff] }
  0x1d   :  { %v239_v40 = vadd.f32 %v223_v32, %v173_v23  ;;  %v236_v49 = vadd.f32 %v220_v43, %v170_v34  ;;  %v202_v51 = vld [vmem:[#allocation4 + $0x2d0] sm:$0xff]  ;;  %v203_v52 = vld [vmem:[#allocation4 + $0x2d8] sm:$0xff]  ;;  %v183_v58 = vld [vmem:[#allocation4 + $0x240] sm:$0xff] }
  0x1e   :  { %813 = vst [vmem:[#allocation2 + $0xb0] sm:$0xff] %v812_v38   ;;  %v789_v53 = vld [vmem:[#allocation2 + $0x60] sm:$0xff]  ;;  %v237_v54 = vadd.f32 %v221_v44, %v171_v41  ;;  %v218_v55 = vmul.f32 %v202_v51, %v185_v46  ;;  %v219_v56 = vmul.f32 %v203_v52, %v186_v47  ;;  %v184_v59 = vld [vmem:[#allocation4 + $0x248] sm:$0xff]  ;;  %v164_v5 = vld [vmem:[#allocation4 + $0x1b0] sm:$0xff] }
  0x1f   :  { %v887_v48 = vpack.c.bf16 %v239_v40, %v238_v39  ;;  %481 = vmatpush.bf16.msra.mxu0 %v790_v37  ;;  %v200_v60 = vld [vmem:[#allocation4 + $0x2c0] sm:$0xff]  ;;  %v201_v61 = vld [vmem:[#allocation4 + $0x2c8] sm:$0xff]  ;;  %v181_v6 = vld [vmem:[#allocation4 + $0x230] sm:$0xff] }
  0x20   :  { %v882_v62 = vpack.c.bf16 %v237_v54, %v236_v49  ;;  %v234_v63 = vadd.f32 %v218_v55, %v168_v45  ;;  %v235_v0 = vadd.f32 %v219_v56, %v169_v50  ;;  %v167_v1 = vld [vmem:[#allocation4 + $0x1c8] sm:$0xff]  ;;  %v216_v2 = vmul.f32 %v200_v60, %v183_v58  ;;  %v182_v7 = vld [vmem:[#allocation4 + $0x238] sm:$0xff]  ;;  %v198_v11 = vld [vmem:[#allocation4 + $0x2b0] sm:$0xff] }
  0x21   :  { %942 = vst [vmem:[#allocation2 + $0xa0] sm:$0xff] %v887_v48   ;;  %v788_v3 = vld [vmem:[#allocation2 + $0x48] sm:$0xff]  ;;  %v217_v4 = vmul.f32 %v201_v61, %v184_v59  ;;  %v165_v10 = vld [vmem:[#allocation4 + $0x1b8] sm:$0xff]  ;;  %v214_v14 = vmul.f32 %v198_v11, %v181_v6  ;;  %v787_v32 = vld [vmem:[#allocation2 + $0x10] sm:$0xff] }
  0x22   :  { %941 = vst [vmem:[#allocation2 + $0x70] sm:$0xff] %v882_v62   ;;  %v877_v8 = vpack.c.bf16 %v235_v0, %v234_v63  ;;  %v232_v9 = vadd.f32 %v216_v2, %v166_v57  ;;  %v199_v12 = vld [vmem:[#allocation4 + $0x2b8] sm:$0xff]  ;;  %v162_v16 = vld [vmem:[#allocation4 + $0x1a0] sm:$0xff]  ;;  %v180_v18 = vld [vmem:[#allocation4 + $0x228] sm:$0xff] }
  0x23   :  { %482 = vmatpush.bf16.msra.mxu0 %v789_v53  ;;  %v233_v13 = vadd.f32 %v217_v4, %v167_v1  ;;  %v215_v15 = vmul.f32 %v199_v12, %v182_v7  ;;  %v179_v17 = vld [vmem:[#allocation4 + $0x220] sm:$0xff]  ;;  %v163_v19 = vld [vmem:[#allocation4 + $0x1a8] sm:$0xff]  ;;  %v230_v23 = vadd.f32 %v214_v14, %v164_v5  ;;  %v149_v26 = vld [vmem:[%s1073_s2] sm:$0x1] }
  0x24   :  { %940 = vst [vmem:[#allocation2 + $0x50] sm:$0xff] %v877_v8   ;;  %v196_v20 = vld [vmem:[#allocation4 + $0x2a0] sm:$0xff]  ;;  %v197_v21 = vld [vmem:[#allocation4 + $0x2a8] sm:$0xff]  ;;  %v681_v27 = vld [vmem:[%s1073_s2 + $0x1] sm:$0x1] }
  0x25   :  { %v872_v22 = vpack.c.bf16 %v233_v13, %v232_v9  ;;  %v231_v24 = vadd.f32 %v215_v15, %v165_v10  ;;  %v212_v25 = vmul.f32 %v196_v20, %v179_v17  ;;  %v682_v28 = vld [vmem:[%s1073_s2 + $0x2] sm:$0x1]  ;;  %v213_v30 = vmul.f32 %v197_v21, %v180_v18  ;;  %v785_v41 = vld [vmem:[#allocation2 + $0xb0] sm:$0xff]  ;;  %v175_v57 = vld [vmem:[#allocation4 + $0x200] sm:$0xff] }
  0x26   :  { %v154_v31 = vmul.f32 %v682_v28, %v681_v27  ;;  %v786_v39 = vld [vmem:[#allocation2] sm:$0xff]  ;;  %v177_v47 = vld [vmem:[#allocation4 + $0x210] sm:$0xff]  ;;  %v176_v58 = vld [vmem:[#allocation4 + $0x208] sm:$0xff] }
  0x27   :  { %483 = vmatpush.bf16.msra.mxu0 %v788_v3  ;;  %939 = vst [vmem:[#allocation2 + $0x38] sm:$0xff] %v872_v22   ;;  %v867_v33 = vpack.c.bf16 %v231_v24, %v230_v23  ;;  %v228_v34 = vadd.f32 %v212_v25, %v162_v16  ;;  %v229_v35 = vadd.f32 %v213_v30, %v163_v19  ;;  %v409_v42 = vld [vmem:[%s1071_s0] sm:$0xff]  ;;  %v194_v49 = vld [vmem:[#allocation4 + $0x290] sm:$0xff]  ;;  %v193_v60 = vld [vmem:[#allocation4 + $0x288] sm:$0xff] }
  0x28   :  { %v800_v29 = vld [vmem:[#allocation2 + $0xa0] sm:$0xff]  ;;  %v155_v36 = vadd.f32 %v154_v31, %v149_v26  ;;  %v410_v44 = vpack.c.bf16 %v409_v42, %v409_v42  ;;  %v210_v51 = vmul.f32 %v194_v49, %v177_v47  ;;  %v160_v52 = vld [vmem:[#allocation4 + $0x190] sm:$0xff]  ;;  %v159_v0 = vld [vmem:[#allocation4 + $0x188] sm:$0xff]  ;;  %v209_v1 = vmul.f32 %v193_v60, %v176_v58 }
  0x29   :  { %564 = vmatpush.bf16.msra.mxu1 %v800_v29  ;;  %v799_v37 = vld [vmem:[#allocation2 + $0x70] sm:$0xff]  ;;  %938 = vst [vmem:[#allocation2 + $0x98] sm:$0xff] %v867_v33   ;;  %v862_v38 = vpack.c.bf16 %v229_v35, %v228_v34  ;;  %v178_v48 = vld [vmem:[#allocation4 + $0x218] sm:$0xff]  ;;  %v192_v59 = vld [vmem:[#allocation4 + $0x280] sm:$0xff] }
  0x2a   :  { %156 = vst [vmem:[#allocation3] sm:$0x1] %v155_v36  ;;  %v195_v50 = vld [vmem:[#allocation4 + $0x298] sm:$0xff]  ;;  %v226_v55 = vadd.f32 %v210_v51, %v160_v52  ;;  %v208_v61 = vmul.f32 %v192_v59, %v175_v57  ;;  %v158_v63 = vld [vmem:[#allocation4 + $0x180] sm:$0xff]  ;;  %v225_v3 = vadd.f32 %v209_v1, %v159_v0  ;;  %v298_v7 = vld [vmem:[#allocation4 + $0x370] sm:$0xff] }
  0x2b   :  { %484 = vmatpush.bf16.msra.mxu0 %v787_v32  ;;  %v798_v40 = vld [vmem:[#allocation2 + $0x50] sm:$0xff]  ;;  %937 = vst [vmem:[#allocation2 + $0x18] sm:$0xff] %v862_v38   ;;  %v161_v53 = vld [vmem:[#allocation4 + $0x198] sm:$0xff]  ;;  %v211_v54 = vmul.f32 %v195_v50, %v178_v48  ;;  %v296_v15 = vld [vmem:[#allocation4 + $0x360] sm:$0xff] }
  0x2c   :  { %v224_v2 = vadd.f32 %v208_v61, %v158_v63  ;;  %v299_v8 = vld [vmem:[#allocation4 + $0x378] sm:$0xff]  ;;  %v315_v9 = vld [vmem:[#allocation4 + $0x3f0] sm:$0xff]  ;;  %v297_v16 = vld [vmem:[#allocation4 + $0x368] sm:$0xff] }
  0x2d   :  { %565 = vmatpush.bf16.msra.mxu1 %v799_v37  ;;  %v227_v56 = vadd.f32 %v211_v54, %v161_v53  ;;  %v316_v10 = vld [vmem:[#allocation4 + $0x3f8] sm:$0xff]  ;;  %v332_v11 = vld [vmem:[#allocation4 + $0x470] sm:$0xff]  ;;  %v313_v17 = vld [vmem:[#allocation4 + $0x3e0] sm:$0xff] }
  0x2e   :  { %v797_v43 = vld [vmem:[#allocation2 + $0x38] sm:$0xff]  ;;  %v852_v4 = vpack.c.bf16 %v225_v3, %v224_v2  ;;  %v348_v13 = vmul.f32 %v332_v11, %v315_v9  ;;  %v314_v18 = vld [vmem:[#allocation4 + $0x3e8] sm:$0xff]  ;;  %v330_v19 = vld [vmem:[#allocation4 + $0x460] sm:$0xff] }
  0x2f   :  { %485 = vmatpush.bf16.msra.mxu0 %v786_v39  ;;  %v857_v62 = vpack.c.bf16 %v227_v56, %v226_v55  ;;  %v333_v12 = vld [vmem:[#allocation4 + $0x478] sm:$0xff]  ;;  %v331_v20 = vld [vmem:[#allocation4 + $0x468] sm:$0xff]  ;;  %v346_v23 = vmul.f32 %v330_v19, %v313_v17  ;;  %v294_v25 = vld [vmem:[#allocation4 + $0x350] sm:$0xff] }
  0x30   :  { %v796_v45 = vld [vmem:[#allocation2 + $0x98] sm:$0xff]  ;;  %853 = vst [vmem:[#allocation2 + $0x88] sm:$0xff] %v852_v4   ;;  %v349_v14 = vmul.f32 %v333_v12, %v316_v10  ;;  %v364_v21 = vadd.f32 %v348_v13, %v298_v7  ;;  %v347_v24 = vmul.f32 %v331_v20, %v314_v18  ;;  %v292_v35 = vld [vmem:[#allocation4 + $0x340] sm:$0xff]  ;;  %v293_v36 = vld [vmem:[#allocation4 + $0x348] sm:$0xff] }
  0x31   :  { %566 = vmatpush.bf16.msra.mxu1 %v798_v40  ;;  %936 = vst [vmem:[#allocation2 + $0x90] sm:$0xff] %v857_v62   ;;  %v295_v26 = vld [vmem:[#allocation4 + $0x358] sm:$0xff]  ;;  %v311_v27 = vld [vmem:[#allocation4 + $0x3d0] sm:$0xff]  ;;  %v362_v32 = vadd.f32 %v346_v23, %v296_v15  ;;  %v309_v37 = vld [vmem:[#allocation4 + $0x3c0] sm:$0xff] }
  0x32   :  { %v795_v46 = vld [vmem:[#allocation2 + $0x18] sm:$0xff]  ;;  %v365_v22 = vadd.f32 %v349_v14, %v299_v8  ;;  %v363_v33 = vadd.f32 %v347_v24, %v297_v16  ;;  %v310_v39 = vld [vmem:[#allocation4 + $0x3c8] sm:$0xff]  ;;  %v326_v40 = vld [vmem:[#allocation4 + $0x440] sm:$0xff] }
  0x33   :  { %486 = vmatpush.bf16.msra.mxu0 %v785_v41  ;;  %v312_v28 = vld [vmem:[#allocation4 + $0x3d8] sm:$0xff]  ;;  %v328_v29 = vld [vmem:[#allocation4 + $0x450] sm:$0xff]  ;;  %v327_v41 = vld [vmem:[#allocation4 + $0x448] sm:$0xff] }
  0x34   :  { %v329_v30 = vld [vmem:[#allocation4 + $0x458] sm:$0xff]  ;;  %v927_v31 = vpack.c.bf16 %v365_v22, %v364_v21  ;;  %v344_v34 = vmul.f32 %v328_v29, %v311_v27  ;;  %v922_v42 = vpack.c.bf16 %v363_v33, %v362_v32  ;;  %v307_v48 = vld [vmem:[#allocation4 + $0x3b0] sm:$0xff]  ;;  %v288_v57 = vld [vmem:[#allocation4 + $0x320] sm:$0xff] }
  0x35   :  { %567 = vmatpush.bf16.msra.mxu1 %v797_v43  ;;  %v345_v38 = vmul.f32 %v329_v30, %v312_v28  ;;  %v291_v47 = vld [vmem:[#allocation4 + $0x338] sm:$0xff]  ;;  %v324_v51 = vld [vmem:[#allocation4 + $0x430] sm:$0xff]  ;;  %v289_v58 = vld [vmem:[#allocation4 + $0x328] sm:$0xff] }
  0x36   :  { %487 = vmatmul.bf16.vlgmr.msra.gmra.mxu0 %v410_v44  ;;  %949 = vst [vmem:[#allocation2 + $0x8] sm:$0xff] %v927_v31   ;;  %v360_v43 = vadd.f32 %v344_v34, %v294_v25  ;;  %v342_v44 = vmul.f32 %v326_v40, %v309_v37  ;;  %v308_v50 = vld [vmem:[#allocation4 + $0x3b8] sm:$0xff]  ;;  %v340_v55 = vmul.f32 %v324_v51, %v307_v48  ;;  %v305_v59 = vld [vmem:[#allocation4 + $0x3a0] sm:$0xff]  ;;  %v306_v61 = vld [vmem:[#allocation4 + $0x3a8] sm:$0xff] }
  0x37   :  { %v793_v6 = vld [vmem:[#allocation2 + $0x88] sm:$0xff]  ;;  %v361_v49 = vadd.f32 %v345_v38, %v295_v26  ;;  %v325_v52 = vld [vmem:[#allocation4 + $0x438] sm:$0xff]  ;;  %948 = vst [vmem:[#allocation2 + $0x20] sm:$0xff] %v922_v42   ;;  %v683_v4 = vld [vmem:[%s1073_s2 + $0x3] sm:$0x1] }
  0x38   :  { %v794_v5 = vld [vmem:[#allocation2 + $0x90] sm:$0xff]  ;;  %v358_v53 = vadd.f32 %v342_v44, %v292_v35  ;;  %v341_v56 = vmul.f32 %v325_v52, %v308_v50  ;;  %v322_v62 = vld [vmem:[#allocation4 + $0x420] sm:$0xff]  ;;  %v954_v16 = vld [vmem:[#allocation3] ss:$0 sm:$0xff] }
  0x39   :  { %568 = vmatpush.bf16.msra.mxu1 %v796_v45  ;;  %v343_v45 = vmul.f32 %v327_v41, %v310_v39  ;;  %v917_v60 = vpack.c.bf16 %v361_v49, %v360_v43  ;;  %v323_v63 = vld [vmem:[#allocation4 + $0x428] sm:$0xff]  ;;  %v338_v3 = vmul.f32 %v322_v62, %v305_v59  ;;  %v303_v26 = vld [vmem:[#allocation4 + $0x390] sm:$0xff]  ;;  %v304_v27 = vld [vmem:[#allocation4 + $0x398] sm:$0xff] }
  0x3a   :  { %v357_v2 = vadd.f32 %v341_v56, %v291_v47  ;;  %v339_v7 = vmul.f32 %v323_v63, %v306_v61  ;;  %v320_v28 = vld [vmem:[#allocation4 + $0x410] sm:$0xff]  ;;  %v321_v29 = vld [vmem:[#allocation4 + $0x418] sm:$0xff]  ;;  %v302_v37 = vld [vmem:[#allocation4 + $0x388] sm:$0xff] }
  0x3b   :  { %v359_v54 = vadd.f32 %v343_v45, %v293_v36  ;;  %947 = vst [vmem:[#allocation2 + $0xb8] sm:$0xff] %v917_v60   ;;  %v354_v10 = vadd.f32 %v338_v3, %v288_v57  ;;  %v336_v30 = vmul.f32 %v320_v28, %v303_v26  ;;  %v286_v31 = vld [vmem:[#allocation4 + $0x310] sm:$0xff]  ;;  %v287_v32 = vld [vmem:[#allocation4 + $0x318] sm:$0xff]  ;;  %v337_v33 = vmul.f32 %v321_v29, %v304_v27  ;;  %v301_v36 = vld [vmem:[#allocation4 + $0x380] sm:$0xff] }
  0x3c   :  { %v355_v12 = vadd.f32 %v339_v7, %v289_v58  ;;  %v318_v38 = vld [vmem:[#allocation4 + $0x400] sm:$0xff]  ;;  %v319_v39 = vld [vmem:[#allocation4 + $0x408] sm:$0xff] }
  0x3d   :  { %569 = vmatpush.bf16.msra.mxu1 %v795_v46  ;;  %v290_v46 = vld [vmem:[#allocation4 + $0x330] sm:$0xff]  ;;  %v912_v0 = vpack.c.bf16 %v359_v54, %v358_v53  ;;  %v808_v11 = vld [vmem:[#allocation2 + $0x8] sm:$0xff]  ;;  %v352_v34 = vadd.f32 %v336_v30, %v286_v31  ;;  %v353_v35 = vadd.f32 %v337_v33, %v287_v32  ;;  %v334_v40 = vmul.f32 %v318_v38, %v301_v36  ;;  %v686_v50 = vld [vmem:[%s1073_s2 + $0x6] sm:$0x1] }
  0x3e   :  { %v356_v1 = vadd.f32 %v340_v55, %v290_v46  ;;  %649 = vmatpush.bf16.msra.mxu2 %v808_v11  ;;  %v807_v14 = vld [vmem:[#allocation2 + $0x20] sm:$0xff]  ;;  %v902_v15 = vpack.c.bf16 %v355_v12, %v354_v10  ;;  %v285_v43 = vld [vmem:[#allocation4 + $0x308] sm:$0xff]  ;;  %v335_v44 = vmul.f32 %v319_v39, %v302_v37  ;;  %v688_v52 = vld [vmem:[%s1073_s2 + $0x8] sm:$0x1] }
  0x3f   :  { %946 = vst [vmem:[#allocation2 + $0x80] sm:$0xff] %v912_v0   ;;  %v897_v41 = vpack.c.bf16 %v353_v35, %v352_v34  ;;  %v284_v42 = vld [vmem:[#allocation4 + $0x300] sm:$0xff] }
  0x40   :  { %v907_v9 = vpack.c.bf16 %v357_v2, %v356_v1  ;;  %944 = vst [vmem:[#allocation2 + $0x30] sm:$0xff] %v902_v15   ;;  %v350_v45 = vadd.f32 %v334_v40, %v284_v42  ;;  %v351_v46 = vadd.f32 %v335_v44, %v285_v43  ;;  %v687_v51 = vld [vmem:[%s1073_s2 + $0x7] sm:$0x1] }
  0x41   :  { %570 = vmatpush.bf16.msra.mxu1 %v794_v5  ;;  %v684_v5 = vld [vmem:[%s1073_s2 + $0x4] sm:$0x1]  ;;  %943 = vst [vmem:[#allocation2 + $0x68] sm:$0xff] %v897_v41   ;;  %v405_v53 = vmul.f32 %v688_v52, %v687_v51 }
  0x42   :  { %945 = vst [vmem:[#allocation2 + $0x58] sm:$0xff] %v907_v9   ;;  %650 = vmatpush.bf16.msra.mxu2 %v807_v14  ;;  %v806_v17 = vld [vmem:[#allocation2 + $0xb8] sm:$0xff]  ;;  %v892_v47 = vpack.c.bf16 %v351_v46, %v350_v45 }
  0x43   :  { %v406_v54 = vadd.f32 %v686_v50, %v405_v53 }
  0x44   :  { %893 = vst [vmem:[#allocation2 + $0xa8] sm:$0xff] %v892_v47  }
  0x45   :  { %571 = vmatpush.bf16.msra.mxu1 %v793_v6  ;;  %v685_v6 = vld [vmem:[%s1073_s2 + $0x5] sm:$0x1]  ;;  %408 = vst [vmem:[#allocation3 + $0x2] sm:$0x1] %v406_v54  ;;  %s671_s2 = sshll.u32 %s1074_s3, 4  ;;  %s672_s2 = int_to_ptr.hbm [resolvable:$true] %s671_s2 }
  0x46   :  { %v279_v8 = vmul.f32 %v685_v6, %v684_v5  ;;  %651 = vmatpush.bf16.msra.mxu2 %v806_v17  ;;  %v805_v20 = vld [vmem:[#allocation2 + $0x80] sm:$0xff] }
  0x47   :  { %v803_v25 = vld [vmem:[#allocation2 + $0x30] sm:$0xff] }
  0x48   :  { %v280_v13 = vadd.f32 %v683_v4, %v279_v8  ;;  %v802_v48 = vld [vmem:[#allocation2 + $0x68] sm:$0xff] }
  0x49   :  { %v804_v23 = vld [vmem:[#allocation2 + $0x58] sm:$0xff] }
  0x4a   :  { %282 = vst [vmem:[#allocation3 + $0x1] sm:$0x1] %v280_v13  ;;  %652 = vmatpush.bf16.msra.mxu2 %v805_v20 }
  0x4b   :  { %v801_v49 = vld [vmem:[#allocation2 + $0xa8] sm:$0xff] }
  0x4c   :  { %v956_v61 = vld [vmem:[#allocation3 + $0x2] ss:$0 sm:$0xff] }
  0x4e   :  { %653 = vmatpush.bf16.msra.mxu2 %v804_v23 }
  0x51   :  { %v955_v55 = vld [vmem:[#allocation3 + $0x1] ss:$0 sm:$0xff] }
  0x52   :  { %654 = vmatpush.bf16.msra.mxu2 %v803_v25 }
  0x56   :  { %655 = vmatpush.bf16.msra.mxu2 %v802_v48 }
  0x5a   :  { %656 = vmatpush.bf16.msra.mxu2 %v801_v49 }
  0xb3   :  { %v488_v18 = vpop.f32.mrf.mxu0 }
  0xb4   :  { %v489_v19 = vadd.f32 %v954_v16, %v488_v18 }
  0xb6   :  { %v492_v21 = vmax.f32 %v489_v19, 0.0 }
  0xb8   :  { %v493_v22 = vpack.c.bf16 %v492_v21, %v492_v21 }
  0xba   :  { %572 = vmatmul.bf16.vlgmr.msra.gmra.mxu1 %v493_v22 }
  0xbb   :  { %v490_v24 = vpop.f32.mrf.mxu0 }
 0x137   :  { %v573_v56 = vpop.f32.mrf.mxu1 }
 0x138   :  { %v574_v57 = vadd.f32 %v955_v55, %v573_v56 }
 0x13a   :  { %v577_v58 = vmax.f32 %v574_v57, 0.0 }
 0x13c   :  { %v578_v59 = vpack.c.bf16 %v577_v58, %v577_v58 }
 0x13e   :  { %657 = vmatmul.bf16.vlgmr.msra.gmra.mxu2 %v578_v59 }
 0x13f   :  { %v575_v60 = vpop.f32.mrf.mxu1 }
 0x1c1   :  { %v658_v62 = vpop.f32.mrf.mxu2 }
 0x1c2   :  { %v659_v63 = vadd.f32 %v956_v61, %v658_v62 }
 0x1c4   :  { %957 = vtanh.f32 %v659_v63 }
 0x1c9   :  { %v660_v0 = vpop.f32.mrf.mxu2 }
 0x1ca   :  { %v958_v1 = vpop.eup %957 }
 0x1cb   :  { %663 = vst [vmem:[#allocation7] sm:$0xff] %v958_v1 }
 0x1cc   :  { %674 = dma.vmem_to_hbm [thread:$0]  %s670_s11, 128, %s672_s2, [#allocation6]  }
 0x1cd   :  { %1009 = dma.done.wait [#allocation6], 128  }
 0x1ce   :  { %1010 = vsyncadd [#allocation6], 4294967168 }
 0x1cf   :  { %679 = vsyncpa [#allocation5], 1 }
 0x1d0   :  { %680 = vsyncpa [#allocation6], 1 }

</bundles_post_ra>
